<compile_context>
chip_gen: v7x
topology: tpu7x:2x2x1
jax: 0.10.0
libtpu: 0.0.40
codegen_flags: <defaults>
</compile_context>

<pallas_src>
import math

import jax
import jax.numpy as jnp
from jax.experimental import pallas as pl
from jax.experimental.pallas import tpu as pltpu

LM_DIM = 1280


def _round_up(v, m):
    return ((v + m - 1) // m) * m


def _vmem_capacity_bytes():
    """Physical VMEM per TensorCore; conservative 64 MiB (v7x) fallback."""
    try:
        return int(pltpu.get_tpu_info().vmem_capacity_bytes)
    except Exception:
        return 64 * 1024 * 1024


# ----------------------------- kernel ---------------------------------------

def _make_kernel(num_cat, offsets, total_vocab, use_dense, emb_dim):
    """Row-tile kernel: out = multihot @ wc + x @ dense_w + bias."""

    def kernel(*refs):
        it = iter(refs)
        x_ref = next(it)
        wc_ref = next(it) if num_cat > 0 else None
        bw_ref = next(it) if use_dense else None
        bc_ref = next(it)
        out_ref = next(it)

        xv = x_ref[...]                                   # [T, W]
        T = xv.shape[0]

        acc = None
        if num_cat > 0:
            xf = xv.astype(jnp.float32)
            # One f32 iota over the concatenated vocabulary; per-feature offsets
            # are Python constants so all lookups collapse into ONE matmul
            # against the stacked (precomposed) embedding table.
            iota = jax.lax.broadcasted_iota(
                jnp.int32, (T, total_vocab), 1).astype(jnp.float32)
            mh = None
            for i in range(num_cat):
                ids = xf[:, i:i + 1] + float(offsets[i])  # [T, 1], exact ints
                oh = (ids == iota).astype(jnp.float32)    # disjoint one-hot
                mh = oh if mh is None else mh + oh
            acc = jnp.dot(mh, wc_ref[...], preferred_element_type=jnp.float32)

        if use_dense:
            # Scalar Linear (+ LM Linear, precomposed) in one matmul directly on
            # the raw x block: id columns hit zero weight rows.
            d = jnp.dot(xv, bw_ref[...], preferred_element_type=jnp.float32)
            acc = d if acc is None else acc + d

        if acc is None:
            acc = jnp.zeros((T, emb_dim), jnp.float32)

        acc = acc + bc_ref[...]
        out_ref[...] = acc.astype(out_ref.dtype)

    return kernel


# ----------------------------- params ---------------------------------------

def init_atom_encoder(key, emb_dim, feature_dims, lm_embedding_type=None):
    cat_dims, num_scalar = feature_dims
    num_keys = len(cat_dims) + 4
    keys = jax.random.split(key, num_keys)
    params = {}

    # Embedding tables: xavier_uniform_
    tables = []
    for i, dim in enumerate(cat_dims):
        a = math.sqrt(6.0 / (dim + emb_dim))
        tables.append(jax.random.uniform(keys[i], (dim, emb_dim),
                                         jnp.float32, minval=-a, maxval=a))
    params['tables'] = tables

    # Scalar linear (stored transposed: [num_scalar, emb_dim])
    if num_scalar > 0:
        bound = 1.0 / math.sqrt(num_scalar)
        params['w'] = jax.random.uniform(keys[-4], (num_scalar, emb_dim),
                                         jnp.float32, minval=-bound, maxval=bound)
        params['b'] = jax.random.uniform(keys[-3], (emb_dim,),
                                         jnp.float32, minval=-bound, maxval=bound)

    if lm_embedding_type is not None:
        assert lm_embedding_type == 'esm'
        bound = 1.0 / math.sqrt(LM_DIM + emb_dim)
        params['lm_w'] = jax.random.uniform(keys[-2], (emb_dim + LM_DIM, emb_dim),
                                            jnp.float32, minval=-bound, maxval=bound)
        params['lm_b'] = jax.random.uniform(keys[-1], (emb_dim,),
                                            jnp.float32, minval=-bound, maxval=bound)
    return params


# --------------------------- weight prep (hoisted) ---------------------------

def prepare_atom_encoder(params, emb_dim, feature_dims, lm_embedding_type=None):
    """One-time prep: stack tables, precompose with lm_w[:E], fold biases."""
    cat_dims, num_scalar = feature_dims
    num_cat = len(cat_dims)
    has_lm = lm_embedding_type is not None
    if has_lm:
        assert lm_embedding_type == 'esm'
    lm_dim = LM_DIM if has_lm else 0
    width = num_cat + num_scalar + lm_dim
    total_vocab = sum(cat_dims)
    assert total_vocab < 2 ** 24, "ids must round-trip exactly through float32"

    offsets = [0]
    for d in list(cat_dims)[:-1]:
        offsets.append(offsets[-1] + d)

    prepared = dict(num_cat=num_cat, offsets=tuple(offsets),
                    total_vocab=total_vocab, num_scalar=num_scalar,
                    has_lm=has_lm, lm_dim=lm_dim, emb_dim=emb_dim, width=width)

    w_acc = params['lm_w'][:emb_dim] if has_lm else None   # [E, E]

    if num_cat > 0:
        tbl = jnp.concatenate(list(params['tables']), axis=0)      # [V, E]
        prepared['wc'] = (tbl @ w_acc) if has_lm else tbl

    use_dense = (num_scalar > 0) or has_lm
    prepared['use_dense'] = use_dense
    if use_dense:
        rows = [jnp.zeros((num_cat, emb_dim), jnp.float32)]        # id cols -> 0
        if num_scalar > 0:
            rows.append((params['w'] @ w_acc) if has_lm else params['w'])
        if has_lm:
            rows.append(params['lm_w'][emb_dim:])                  # [1280, E]
        prepared['big_w'] = jnp.concatenate(rows, axis=0)          # [width, E]

    bc = jnp.zeros((emb_dim,), jnp.float32)
    if num_scalar > 0:
        bc = (params['b'] @ w_acc) if has_lm else params['b']
    if has_lm:
        bc = bc + params['lm_b']
    prepared['bc'] = bc.reshape(1, emb_dim)
    return prepared


# ----------------------------- forward ---------------------------------------

def atom_encoder_forward(prepared, x, *, tile_rows=None, out_dtype=jnp.float32):
    E = prepared['emb_dim']
    W = prepared['width']
    num_cat = prepared['num_cat']
    use_dense = prepared['use_dense']
    assert x.shape[1] == W
    N = x.shape[0]

    in_row_bytes = W * x.dtype.itemsize
    out_row_bytes = E * jnp.dtype(out_dtype).itemsize
    cap = _vmem_capacity_bytes()

    # Tile sizing: ~half of VMEM for the double-buffered x / out blocks,
    # capped at 8192 rows, then clamped so there are >= 2 (load-balanced) tiles
    # so the "parallel" grid axis keeps both v7x TensorCores busy.
    if tile_rows is None:
        budget = cap // 2
        tile_rows = budget // (2 * (in_row_bytes + out_row_bytes))
        tile_rows = max(8, min(8192, tile_rows))
    T = min(int(tile_rows), _round_up(pl.cdiv(N, 2), 8))
    T = max(8, (T // 8) * 8)
    n_tiles = pl.cdiv(N, T)

    inputs = [x]
    in_specs = [pl.BlockSpec((T, W), lambda i: (i, 0))]
    weight_bytes = 0
    if num_cat > 0:
        wc = prepared['wc']
        inputs.append(wc)
        in_specs.append(pl.BlockSpec(wc.shape, lambda i: (0, 0)))   # resident
        weight_bytes += wc.size * wc.dtype.itemsize
    if use_dense:
        bw = prepared['big_w']
        inputs.append(bw)
        in_specs.append(pl.BlockSpec(bw.shape, lambda i: (0, 0)))   # resident
        weight_bytes += bw.size * bw.dtype.itemsize
    bc = prepared['bc']
    inputs.append(bc)
    in_specs.append(pl.BlockSpec(bc.shape, lambda i: (0, 0)))       # resident
    weight_bytes += bc.size * bc.dtype.itemsize

    # vmem_limit: actual double-buffered footprint + headroom, below physical.
    buf_bytes = 2 * T * (in_row_bytes + out_row_bytes) + 2 * weight_bytes
    vmem_limit = max(32 << 20, buf_bytes + (8 << 20))
    vmem_limit = min(vmem_limit, cap - (4 << 20))

    kernel = _make_kernel(num_cat, prepared['offsets'], prepared['total_vocab'],
                          use_dense, E)

    out = pl.pallas_call(
        kernel,
        out_shape=jax.ShapeDtypeStruct((N, E), out_dtype),
        grid=(n_tiles,),
        in_specs=in_specs,
        out_specs=pl.BlockSpec((T, E), lambda i: (i, 0)),
        compiler_params=pltpu.CompilerParams(
            dimension_semantics=("parallel",),
            vmem_limit_bytes=int(vmem_limit)),
    )(*inputs)
    return out


# ----------------------------- reference -------------------------------------

def atom_encoder_reference(params, x, emb_dim, feature_dims, lm_embedding_type=None):
    """Plain-JAX f32 reference mirroring the PyTorch forward exactly."""
    cat_dims, num_scalar = feature_dims
    num_cat = len(cat_dims)
    emb = jnp.zeros((x.shape[0], emb_dim), jnp.float32)
    for i in range(num_cat):
        idx = x[:, i].astype(jnp.int32)
        emb = emb + params['tables'][i][idx]
    if num_scalar > 0:
        scal = x[:, num_cat:num_cat + num_scalar].astype(jnp.float32)
        emb = emb + scal @ params['w'] + params['b']
    if lm_embedding_type is not None:
        lm = x[:, -LM_DIM:].astype(jnp.float32)
        emb = jnp.concatenate([emb, lm], axis=1) @ params['lm_w'] + params['lm_b']
    return emb


# ----------------------------- test ------------------------------------------

if __name__ == "__main__":
    key = jax.random.PRNGKey(0)
    emb_dim = 32
    feature_dims = ([16, 8, 4], 5)      # 3 categorical features, 5 scalar features
    sigma_embed_dim = 8                 # unused by the forward pass (as in PyTorch)

    k_params, k_ids, k_scal, k_lm = jax.random.split(key, 4)

    def make_x(n):
        cols = []
        id_keys = jax.random.split(k_ids, len(feature_dims[0]))
        for kk, dim in zip(id_keys, feature_dims[0]):
            cols.append(jax.random.randint(kk, (n, 1), 0, dim).astype(jnp.float32))
        cols.append(jax.random.normal(k_scal, (n, feature_dims[1]), jnp.float32))
        return jnp.concatenate(cols, axis=1)

    # Tolerances: MXU pass decomposition of f32 matmuls + (esm) host-side weight
    # precomposition change rounding order vs the plain-f32 reference.

    # ---------- config 1: lm_embedding_type = None, single tile, auto tiling ----
    params = init_atom_encoder(k_params, emb_dim, feature_dims, lm_embedding_type=None)
    prep = prepare_atom_encoder(params, emb_dim, feature_dims, lm_embedding_type=None)
    x1 = make_x(8)
    out1 = jax.block_until_ready(atom_encoder_forward(prep, x1))
    ref1 = atom_encoder_reference(params, x1, emb_dim, feature_dims, None)
    assert out1.shape == (8, emb_dim)
    assert jnp.allclose(out1, ref1, atol=5e-3, rtol=5e-3)

    # ---------- config 2: no LM, multi-tile with non-divisible tail (no pad pass) --
    x2 = make_x(300)
    out2 = jax.block_until_ready(atom_encoder_forward(prep, x2, tile_rows=128))
    ref2 = atom_encoder_reference(params, x2, emb_dim, feature_dims, None)
    assert out2.shape == (300, emb_dim)
    assert jnp.allclose(out2, ref2, atol=5e-3, rtol=5e-3)

    # ---------- config 3: lm_embedding_type = 'esm' (1280-d LM), 3 tiles ----------
    params_esm = init_atom_encoder(k_params, emb_dim, feature_dims, lm_embedding_type='esm')
    prep_esm = prepare_atom_encoder(params_esm, emb_dim, feature_dims, lm_embedding_type='esm')
    x_small = make_x(40)
    lm_feats = jax.random.normal(k_lm, (40, LM_DIM), jnp.float32)
    x3 = jnp.concatenate([x_small, lm_feats], axis=1)          # [40, 1288]
    out3 = jax.block_until_ready(atom_encoder_forward(prep_esm, x3, tile_rows=16))
    ref3 = atom_encoder_reference(params_esm, x3, emb_dim, feature_dims, 'esm')
    assert out3.shape == (40, emb_dim)
    assert jnp.allclose(out3, ref3, atol=2e-2, rtol=2e-2)

    # ---------- config 4: esm path with automatic (VMEM-aware, >=2 tiles) tiling --
    out4 = jax.block_until_ready(atom_encoder_forward(prep_esm, x3))
    assert out4.shape == (40, emb_dim)
    assert jnp.allclose(out4, ref3, atol=2e-2, rtol=2e-2)

    print("KERNEL_OK")
</pallas_src>

<mosaic_0001>
module attributes {stable_mosaic.version = 11 : i64} {
  func.func @kernel(%arg0: i32, %arg1: memref<8x8xf32, #tpu.memory_space<vmem>>, %arg2: memref<28x32xf32, #tpu.memory_space<vmem>>, %arg3: memref<8x32xf32, #tpu.memory_space<vmem>>, %arg4: memref<1x32xf32, #tpu.memory_space<vmem>>, %arg5: memref<8x32xf32, #tpu.memory_space<vmem>>) attributes {dimension_semantics = [#tpu.dimension_semantics<parallel>], iteration_bounds = array<i64: 1>, scalar_prefetch = 0 : i64, scratch_operands = 0 : i64, tpu.core_type = #tpu.core_type<tc>, window_params = [{transform_indices = @transform_0, window_bounds = array<i64: 8, 8>}, {pipeline_mode = #tpu.pipeline_mode<synchronous>, transform_indices = @transform_1, window_bounds = array<i64: 28, 32>}, {pipeline_mode = #tpu.pipeline_mode<synchronous>, transform_indices = @transform_2, window_bounds = array<i64: 8, 32>}, {pipeline_mode = #tpu.pipeline_mode<synchronous>, transform_indices = @transform_3, window_bounds = array<i64: 1, 32>}, {transform_indices = @transform_4, window_bounds = array<i64: 8, 32>}]} {
    %c0 = arith.constant 0 : index
    %c0_0 = arith.constant 0 : index
    %0 = vector.load %arg1[%c0, %c0_0] : memref<8x8xf32, #tpu.memory_space<vmem>>, vector<8x8xf32>
    %1 = tpu.iota {dimensions = array<i32: 1>} : vector<8x28xi32>
    %2 = arith.sitofp %1 : vector<8x28xi32> to vector<8x28xf32>
    %3 = vector.extract_strided_slice %0 {offsets = [0, 0], sizes = [8, 1], strides = [1, 1]} : vector<8x8xf32> to vector<8x1xf32>
    %cst = arith.constant 0.000000e+00 : f32
    %4 = vector.broadcast %cst : f32 to vector<8x1xf32>
    %5 = arith.addf %3, %4 : vector<8x1xf32>
    %6 = vector.broadcast %5 : vector<8x1xf32> to vector<8x28xf32>
    %7 = arith.cmpf oeq, %6, %2 : vector<8x28xf32>
    %8 = arith.extui %7 : vector<8x28xi1> to vector<8x28xi32>
    %9 = arith.sitofp %8 : vector<8x28xi32> to vector<8x28xf32>
    %10 = vector.extract_strided_slice %0 {offsets = [0, 1], sizes = [8, 1], strides = [1, 1]} : vector<8x8xf32> to vector<8x1xf32>
    %cst_1 = arith.constant 1.600000e+01 : f32
    %11 = vector.broadcast %cst_1 : f32 to vector<8x1xf32>
    %12 = arith.addf %10, %11 : vector<8x1xf32>
    %13 = vector.broadcast %12 : vector<8x1xf32> to vector<8x28xf32>
    %14 = arith.cmpf oeq, %13, %2 : vector<8x28xf32>
    %15 = arith.extui %14 : vector<8x28xi1> to vector<8x28xi32>
    %16 = arith.sitofp %15 : vector<8x28xi32> to vector<8x28xf32>
    %17 = arith.addf %9, %16 : vector<8x28xf32>
    %18 = vector.extract_strided_slice %0 {offsets = [0, 2], sizes = [8, 1], strides = [1, 1]} : vector<8x8xf32> to vector<8x1xf32>
    %cst_2 = arith.constant 2.400000e+01 : f32
    %19 = vector.broadcast %cst_2 : f32 to vector<8x1xf32>
    %20 = arith.addf %18, %19 : vector<8x1xf32>
    %21 = vector.broadcast %20 : vector<8x1xf32> to vector<8x28xf32>
    %22 = arith.cmpf oeq, %21, %2 : vector<8x28xf32>
    %23 = arith.extui %22 : vector<8x28xi1> to vector<8x28xi32>
    %24 = arith.sitofp %23 : vector<8x28xi32> to vector<8x28xf32>
    %25 = arith.addf %17, %24 : vector<8x28xf32>
    %c0_3 = arith.constant 0 : index
    %c0_4 = arith.constant 0 : index
    %26 = vector.load %arg2[%c0_3, %c0_4] : memref<28x32xf32, #tpu.memory_space<vmem>>, vector<28x32xf32>
    %cst_5 = arith.constant dense<0.000000e+00> : vector<8x32xf32>
    %27 = tpu.matmul %25, %26, %cst_5 {dimension_numbers = #tpu.dot_dimension_numbers<[1], [0], [0], [1], [0, 0, 1, 1], [], []>} : vector<8x28xf32>, vector<28x32xf32>, vector<8x32xf32> -> vector<8x32xf32>
    %c0_6 = arith.constant 0 : index
    %c0_7 = arith.constant 0 : index
    %28 = vector.load %arg3[%c0_6, %c0_7] : memref<8x32xf32, #tpu.memory_space<vmem>>, vector<8x32xf32>
    %cst_8 = arith.constant dense<0.000000e+00> : vector<8x32xf32>
    %29 = tpu.matmul %0, %28, %cst_8 {dimension_numbers = #tpu.dot_dimension_numbers<[1], [0], [0], [1], [0, 0, 1, 1], [], []>} : vector<8x8xf32>, vector<8x32xf32>, vector<8x32xf32> -> vector<8x32xf32>
    %30 = arith.addf %27, %29 : vector<8x32xf32>
    %c0_9 = arith.constant 0 : index
    %c0_10 = arith.constant 0 : index
    %31 = vector.load %arg4[%c0_9, %c0_10] : memref<1x32xf32, #tpu.memory_space<vmem>>, vector<1x32xf32>
    %32 = vector.broadcast %31 : vector<1x32xf32> to vector<8x32xf32>
    %33 = arith.addf %30, %32 : vector<8x32xf32>
    %c0_11 = arith.constant 0 : index
    %c0_12 = arith.constant 0 : index
    %34 = vector.load %arg5[%c0_11, %c0_12] : memref<8x32xf32, #tpu.memory_space<vmem>>, vector<8x32xf32>
    tpu.vector_store %arg5[%c0_11, %c0_12], %33 {strides = array<i32>} : memref<8x32xf32, #tpu.memory_space<vmem>>, vector<8x32xf32>,
    return
  }
  func.func @transform_0(%arg0: i32) -> (i32, i32) {
    %c0_i32 = arith.constant 0 : i32
    %c0_i32_0 = arith.constant 0 : i32
    return %arg0, %c0_i32 : i32, i32
  }
  func.func @transform_1(%arg0: i32) -> (i32, i32) {
    %c0_i32 = arith.constant 0 : i32
    %c0_i32_0 = arith.constant 0 : i32
    %c0_i32_1 = arith.constant 0 : i32
    return %c0_i32, %c0_i32_0 : i32, i32
  }
  func.func @transform_2(%arg0: i32) -> (i32, i32) {
    %c0_i32 = arith.constant 0 : i32
    %c0_i32_0 = arith.constant 0 : i32
    %c0_i32_1 = arith.constant 0 : i32
    return %c0_i32, %c0_i32_0 : i32, i32
  }
  func.func @transform_3(%arg0: i32) -> (i32, i32) {
    %c0_i32 = arith.constant 0 : i32
    %c0_i32_0 = arith.constant 0 : i32
    %c0_i32_1 = arith.constant 0 : i32
    return %c0_i32, %c0_i32_0 : i32, i32
  }
  func.func @transform_4(%arg0: i32) -> (i32, i32) {
    %c0_i32 = arith.constant 0 : i32
    %c0_i32_0 = arith.constant 0 : i32
    return %arg0, %c0_i32 : i32, i32
  }
}

</mosaic_0001>

<bundles_post_ra>
// kernel: tpu_custom_call.1
= control target key start
LH: loop header
LB: loop body
LE: loop exit
PB: predicated region body
PF: predicated region fallthrough
CT: control target
= control target key end

     0   :  { %9 = vsyncpa [#allocation3], 0  ;;  %s508_s0 = inlined_call_operand.hbm [shape: f32[8,8], index: 0, kind: input, shape index: {}]   ;;  %s509_s1 = inlined_call_operand.hbm [shape: f32[28,32], index: 1, kind: input, shape index: {}]   ;;  %s510_s2 = inlined_call_operand.hbm [shape: f32[8,32], index: 2, kind: input, shape index: {}]   ;;  %s511_s3 = inlined_call_operand.vmem [shape: f32[1,32], index: 3, kind: input, shape index: {}]   ;;  %s512_s4 = inlined_call_operand.hbm [shape: f32[8,32], index: 4, kind: output, shape index: {}]  }
   0x1   :  { %10 = vsyncpa [#allocation6], 0 }
   0x2   :  { %11 = vsyncpa [#allocation4], 0  ;;  %s419_s15 = smov [#allocation5]   ;;  %s325_s19 = scalar_lea.hbm %s509_s1, 512 }
   0x3   :  { %s27_s16 = sshll.u32 %s419_s15, 4  ;;  %p326_p0 = scmp.ne.s32.totalorder %s509_s1, %s325_s19  ;;  %s28_s16 = int_to_ptr.vmem [resolvable:$true] %s27_s16 }
   0x4   :  { %p329_p1 = scmp.lt.u32.totalorder %s325_s19, %s509_s1 }
   0x6   :  { %p331_p2 = pnand %p329_p1, %p326_p0 }
   0x8   :  { %334 = shalt.err (!%p331_p2)
}
   0x9   :  { %s335_s24 = scalar_lea.vmem %s28_s16, 512  ;;  %p340_p4 = scmp.lt.s32.totalorder %s28_s16, %s28_s16 }
   0xa   :  { %p336_p3 = scmp.ne.s32.totalorder %s28_s16, %s335_s24  ;;  %p341_p5 = scmp.lt.s32.totalorder %s335_s24, %s335_s24 }
   0xc   :  { %p342_p6 = por %p341_p5, %p340_p4 }
   0xe   :  { %p343_p7 = pnand %p342_p6, %p336_p3 }
  0x10   :  { %346 = shalt.err (!%p343_p7)
}
  0x11   :  { %s420_s25 = smov 128   ;;  %s421_s26 = smov 8  }
  0x12   :  { %33 = dma.hbm_to_vmem [thread:$0]  %s509_s1, 512, %s28_s16, [#allocation6], %s420_s25, %s420_s25, %s421_s26  }
  0x13   :  { %s422_s29 = smov [#allocation2]   ;;  %s423_s5 = smov [#allocation7]  }
  0x14   :  { %s18_s30 = sshll.u32 %s422_s29, 4  ;;  %s40_s6 = sshll.u32 %s423_s5, 4  ;;  %s19_s30 = int_to_ptr.vmem [resolvable:$true] %s18_s30  ;;  %s41_s6 = int_to_ptr.vmem [resolvable:$true] %s40_s6 }
  0x15   :  { %s347_s9 = scalar_lea.hbm %s508_s0, 128 }
  0x16   :  { %p348_p8 = scmp.ne.s32.totalorder %s508_s0, %s347_s9  ;;  %p351_p9 = scmp.lt.u32.totalorder %s347_s9, %s508_s0 }
  0x18   :  { %p353_p10 = pnand %p351_p9, %p348_p8 }
  0x1a   :  { %356 = shalt.err (!%p353_p10)
}
  0x1b   :  { %s357_s1 = scalar_lea.vmem %s19_s30, 128  ;;  %p362_p12 = scmp.lt.s32.totalorder %s19_s30, %s19_s30 }
  0x1c   :  { %p358_p11 = scmp.ne.s32.totalorder %s19_s30, %s357_s1  ;;  %p363_p13 = scmp.lt.s32.totalorder %s357_s1, %s357_s1 }
  0x1e   :  { %p364_p0 = por %p363_p13, %p362_p12 }
  0x20   :  { %p365_p1 = pnand %p364_p0, %p358_p11 }
  0x22   :  { %368 = shalt.err (!%p365_p1)
}
  0x23   :  { %21 = dma.hbm_to_vmem [thread:$0]  %s508_s0, 128, %s19_s30, [#allocation3]  }
  0x24   :  { %s369_s18 = scalar_lea.hbm %s510_s2, 128 }
  0x25   :  { %p370_p2 = scmp.ne.s32.totalorder %s510_s2, %s369_s18  ;;  %p373_p3 = scmp.lt.u32.totalorder %s369_s18, %s510_s2 }
  0x27   :  { %p375_p4 = pnand %p373_p3, %p370_p2 }
  0x29   :  { %378 = shalt.err (!%p375_p4)
}
  0x2a   :  { %s379_s23 = scalar_lea.vmem %s41_s6, 128  ;;  %p384_p6 = scmp.lt.s32.totalorder %s41_s6, %s41_s6 }
  0x2b   :  { %p380_p5 = scmp.ne.s32.totalorder %s41_s6, %s379_s23  ;;  %p385_p7 = scmp.lt.s32.totalorder %s379_s23, %s379_s23 }
  0x2d   :  { %p386_p8 = por %p385_p7, %p384_p6 }
  0x2f   :  { %p387_p9 = pnand %p386_p8, %p380_p5 }
  0x31   :  { %390 = shalt.err (!%p387_p9)
}
  0x32   :  { %43 = dma.hbm_to_vmem [thread:$0]  %s510_s2, 128, %s41_s6, [#allocation6]  }
  0x33   :  { %413 = dma.done.wait [#allocation3], 128  }
  0x34   :  { %414 = vsyncadd [#allocation3], 4294967168 }
  0x35   :  { %415 = dma.done.wait [#allocation6], 640  }
  0x36   :  { %416 = vsyncadd [#allocation6], 4294966656  ;;  %v424_v0 = vmov 0   ;;  %v425_v1 = vmov 2   ;;  %v426_v2 = vmov 0.0   ;;  %v55_v3 = vld [vmem:[#allocation2] sm:$0xff]  ;;  %v56_v15 = vlaneseq }
  0x37   :  { %321 = vset.pattern.permute.xlu0 %v424_v0  ;;  %323 = vset.pattern.permute.xlu1 %v425_v1  ;;  %v78_v4 = vadd.f32 24.0, %v55_v3  ;;  %v68_v5 = vadd.f32 16.0, %v55_v3  ;;  %v88_v6 = vld [vmem:[#allocation5] sm:$0xff]  ;;  %v89_v7 = vld [vmem:[#allocation5 + $0x8] sm:$0xff]  ;;  %v427_v8 = vmov 0.0|0.0   ;;  %v428_v10 = vmov 1  }
  0x38   :  { %285 = vmatprep.subr.mxu0 %v426_v2  ;;  %62 = vperm.xlu0 %321, %v55_v3   ;;  %v302_v9 = vpack.c.bf16 %v89_v7, %v88_v6  ;;  %v90_v11 = vld [vmem:[#allocation5 + $0x10] sm:$0xff]  ;;  %v91_v12 = vld [vmem:[#allocation5 + $0x18] sm:$0xf]  ;;  %vm171_vm0 = vcmask 1043456   ;;  %vm429_vm1 = vmmov 1   ;;  %v92_v14 = vld [vmem:[#allocation7] sm:$0xff] }
  0x39   :  { %81 = vperm.xlu1 %323, %v78_v4   ;;  %301 = vmatprep.subr.bf16.mxu1 %v427_v8  ;;  %v305_v13 = vpack.c.bf16 %v91_v12, %v90_v11  ;;  %vm306_vm2 = vmpackc.low %vm171_vm0, %vm429_vm1  ;;  %vm430_vm3 = vmmov 0   ;;  %vm93_vm4 = vcmask 64512   ;;  %v57_v16 = vand.u32 127, %v56_v15  ;;  %v277_v29 = vld [vmem:[%s511_s3] ss:$0 sm:$0xff]  ;;  %s431_s26 = smov [#allocation8]  }
  0x3a   :  { %303 = vmatpush3.bf16.msra.mxu1 %v302_v9  ;;  %286 = vmatpush3.msra.mxu0 %v92_v14  ;;  %vm167_vm8 = vcmask 228352   ;;  %s261_s27 = sshll.u32 %s431_s26, 4  ;;  %vm253_vm9 = vcmask 261120   ;;  %s262_s27 = int_to_ptr.vmem [resolvable:$true] %s261_s27 }
  0x3b   :  { %304 = vmatprep.subr.bf16.mxu1 %v427_v8  ;;  %287 = vmatprep.mubr.msk.f32.mxu0 %vm430_vm3, %v426_v2  ;;  %v58_v17 = vcvt.s32.f32 %v57_v16  ;;  %s391_s28 = scalar_lea.vmem %s262_s27, 128  ;;  %p396_p11 = scmp.lt.s32.totalorder %s262_s27, %s262_s27 }
  0x3c   :  { %322 = vset.pattern.permute.xlu0 %v428_v10  ;;  %288 = vmatmul.mubr.msk.f32.vlgmr.msra.gmra.mrb[0].mxu0 %vm93_vm4, %v55_v3  ;;  %p392_p10 = scmp.ne.s32.totalorder %s262_s27, %s391_s28  ;;  %p397_p12 = scmp.lt.s32.totalorder %s391_s28, %s391_s28 }
  0x3d   :  { %71 = vperm.xlu0 %322, %v68_v5   ;;  %298 = vmatprep.mubr.msk.f32.mxu1 %vm430_vm3, %v426_v2 }
  0x3e   :  { %307 = vmatpush3.bf16.msk.msra.mxu1 %vm306_vm2, %v305_v13  ;;  %p398_p13 = por %p397_p12, %p396_p11 }
  0x40   :  { %p399_p0 = pnand %p398_p13, %p392_p10 }
  0x41   :  { %324 = vset.pattern.permute.xlu0 %v425_v1 }
  0xb7   :  { %v63_v18 = vpop.permute.xlu0 %62 }
  0xb8   :  { %v82_v19 = vpop.permute.xlu1 %81  ;;  %vm65_vm5 = vcmp.eq.f32.partialorder %v63_v18, %v58_v17 }
  0xb9   :  { %vm84_vm6 = vcmp.eq.f32.partialorder %v82_v19, %v58_v17  ;;  %v271_v21 = vsel %vm65_vm5, 1.0, %v426_v2 }
  0xba   :  { %v273_v23 = vsel %vm84_vm6, 1.0, %v426_v2 }
  0xbc   :  { %v72_v20 = vpop.permute.xlu0 %71 }
  0xbd   :  { %vm74_vm7 = vcmp.eq.f32.partialorder %v72_v20, %v58_v17 }
  0xbe   :  { %v272_v22 = vsel %vm74_vm7, 1.0, %v426_v2 }
  0xbf   :  { %v77_v24 = vadd.f32 %v272_v22, %v271_v21 }
  0xc1   :  { %v87_v25 = vadd.f32 %v273_v23, %v77_v24 }
  0xc3   :  { %299 = vmatmul.mubr.msk.f32.vlgmr.msra.gmra.mrb[0].mxu1 %vm167_vm8, %v87_v25 }
 0x10f   :  { %v163_v26 = vpop.f32.mrb[0].mxu0 }
 0x110   :  { %v289_v27 = vpop.f32.mrb[1].mxu0 }
 0x196   :  { %v241_v28 = vpop.f32.mrb[0].mxu1 }
 0x197   :  { %v242_v30 = vadd.f32 %v241_v28, %v163_v26  ;;  %v300_v31 = vpop.f32.mrb[1].mxu1 }
 0x199   :  { %v252_v32 = vadd.f32 %v277_v29, %v242_v30 }
 0x19b   :  { %254 = vst.msk [vmem:[#allocation8] sm:$0xff] %vm253_vm9, %v252_v32 }
 0x19c   :  { %402 = shalt.err (!%p399_p0)
}
 0x19d   :  { %s403_s5 = scalar_lea.hbm %s512_s4, 128 }
 0x19e   :  { %p404_p1 = scmp.ne.s32.totalorder %s512_s4, %s403_s5  ;;  %p407_p2 = scmp.lt.u32.totalorder %s403_s5, %s512_s4 }
 0x1a0   :  { %p409_p3 = pnand %p407_p2, %p404_p1 }
 0x1a2   :  { %412 = shalt.err (!%p409_p3)
}
 0x1a3   :  { %264 = dma.vmem_to_hbm [thread:$0]  %s262_s27, 128, %s512_s4, [#allocation4]  }
 0x1a4   :  { %417 = dma.done.wait [#allocation4], 128  }
 0x1a5   :  { %418 = vsyncadd [#allocation4], 4294967168 }
 0x1a6   :  { %268 = vsyncpa [#allocation3], 1 }
 0x1a7   :  { %269 = vsyncpa [#allocation6], 1 }
 0x1a8   :  { %270 = vsyncpa [#allocation4], 1 }

</bundles_post_ra>
